<compile_context>
chip_gen: v7x
topology: tpu7x:2x2x1
jax: 0.10.0
libtpu: 0.0.40
codegen_flags: <defaults>
</compile_context>

<pallas_src>
import jax
import jax.numpy as jnp
from jax.experimental import pallas as pl
from jax.experimental.pallas import tpu as pltpu

LOG_STD_MAX = 2.0
LOG_STD_MIN = -20.0

_MAX_TILE_B = 2048          # rows per grid step; double-buffered x+out is only a few MiB
_MIN_B_FOR_TWO_STEPS = 256  # v7x: give the 2nd TensorCore work once B is big enough
_MIN_PALLAS_BATCH = 16      # below this, launch overhead dominates -> XLA bypass


# ----------------------------- Pallas kernel ------------------------------ #
def _policy_kernel(x_ref, w1_ref, b1_ref, w2_ref, b2_ref, w3_ref, b3_ref,
                   mean_ref):
    # hidden layer 1: tanh(x @ W1 + b1)   (MXU matmul, f32 accumulation)
    h = jnp.tanh(
        jnp.dot(x_ref[...], w1_ref[...], preferred_element_type=jnp.float32)
        + b1_ref[...])
    # hidden layer 2: tanh(h @ W2 + b2)
    h = jnp.tanh(
        jnp.dot(h.astype(w2_ref.dtype), w2_ref[...],
                preferred_element_type=jnp.float32)
        + b2_ref[...])
    # mean head (output lane width = true n_out; masked stores are negligible)
    mean_ref[...] = (
        jnp.dot(h.astype(w3_ref.dtype), w3_ref[...],
                preferred_element_type=jnp.float32)
        + b3_ref[...]).astype(mean_ref.dtype)


# ------------------------------ helpers ------------------------------------ #
def _round_up(n, m):
    return ((n + m - 1) // m) * m


def _pad2d(x, rows, cols):
    r, c = x.shape
    if (r, c) == (rows, cols):
        return x
    return jnp.pad(x, ((0, rows - r), (0, cols - c)))


# --------------------------- param preparation ------------------------------ #
def prepare_params(w1, b1, w2, b2, w3, b3, log_std, matmul_dtype=jnp.bfloat16):
    """Pads weights/biases ONCE to minimal TPU-friendly shapes; precomputes std.

    * contraction dim of W1 (= x's feature dim) is rounded only to the
      sublane multiple of `matmul_dtype` (8 for f32, 16 for bf16) -- NOT 128.
    * W3 / b3 keep their true output width n_out (lane dim == full dim is legal).
    * matmul_dtype=bfloat16 (default) halves DMA bytes and is MXU-native;
      pass jnp.float32 for bit-tight comparisons.
    """
    n_in, n_hid = w1.shape
    n_out = w3.shape[1]
    sub = 16 if jnp.dtype(matmul_dtype) == jnp.dtype(jnp.bfloat16) else 8
    Ip = _round_up(n_in, sub)          # minimal sublane pad for the K dim
    Hp = _round_up(n_hid, 128)         # hidden stays MXU-lane aligned (cheap, resident)

    padded = dict(
        w1=_pad2d(w1, Ip, Hp).astype(matmul_dtype),
        b1=_pad2d(b1[None, :], 1, Hp).astype(jnp.float32),
        w2=_pad2d(w2, Hp, Hp).astype(matmul_dtype),
        b2=_pad2d(b2[None, :], 1, Hp).astype(jnp.float32),
        w3=_pad2d(w3, Hp, n_out).astype(matmul_dtype),   # true n_out lanes
        b3=b3[None, :].astype(jnp.float32),
    )
    # std is x-independent -> computed once here, never inside the kernel.
    std = jnp.exp(jnp.clip(log_std, LOG_STD_MIN, LOG_STD_MAX)).astype(jnp.float32)
    return padded, std


# ------------------------------ forward ------------------------------------- #
@jax.jit
def _policy_forward_pallas(x, w1p, b1p, w2p, b2p, w3p, b3p):
    B, n_in = x.shape
    Ip, Hp = w1p.shape
    n_out = w3p.shape[1]
    md = w1p.dtype
    sub = 16 if jnp.dtype(md) == jnp.dtype(jnp.bfloat16) else 8

    # Batch tiling: minimal padding (tile_b * steps >= B, slack < steps*sub),
    # and >= 2 steps for large B so both v7x TensorCores get work.
    num_steps = max(1, pl.cdiv(B, _MAX_TILE_B))
    if B >= _MIN_B_FOR_TWO_STEPS:
        num_steps = max(num_steps, 2)
    tile_b = _round_up(pl.cdiv(B, num_steps), sub)
    Bp = tile_b * num_steps

    xp = x.astype(md)
    if (Bp, Ip) != (B, n_in):
        xp = jnp.pad(xp, ((0, Bp - B), (0, Ip - n_in)))

    itemsize = jnp.dtype(md).itemsize
    wparams = Ip * Hp + Hp * Hp + Hp * n_out
    cost = pl.CostEstimate(
        flops=2 * Bp * wparams,
        transcendentals=2 * Bp * Hp,                       # two tanh layers
        bytes_accessed=(Bp * Ip * itemsize + Bp * n_out * 4
                        + wparams * itemsize + (2 * Hp + n_out) * 4),
    )

    const = lambda i: (0, 0)   # weights/biases resident across grid steps
    mean_p = pl.pallas_call(
        _policy_kernel,
        out_shape=jax.ShapeDtypeStruct((Bp, n_out), jnp.float32),
        grid=(num_steps,),
        in_specs=[
            pl.BlockSpec((tile_b, Ip), lambda i: (i, 0)),   # x tile
            pl.BlockSpec((Ip, Hp), const),                  # W1
            pl.BlockSpec((1, Hp), const),                   # b1
            pl.BlockSpec((Hp, Hp), const),                  # W2
            pl.BlockSpec((1, Hp), const),                   # b2
            pl.BlockSpec((Hp, n_out), const),               # W3 (true n_out lanes)
            pl.BlockSpec((1, n_out), const),                # b3
        ],
        out_specs=pl.BlockSpec((tile_b, n_out), lambda i: (i, 0)),
        compiler_params=pltpu.CompilerParams(
            dimension_semantics=("parallel",)),
        cost_estimate=cost,
    )(xp, w1p, b1p, w2p, b2p, w3p, b3p)

    return mean_p[:B] if Bp != B else mean_p


@jax.jit
def _policy_forward_xla(x, w1p, b1p, w2p, b2p, w3p, b3p):
    """Tiny-batch bypass: plain XLA, avoids pad/launch/slice fixed costs."""
    n_in = x.shape[1]
    Ip = w1p.shape[0]
    xp = jnp.pad(x, ((0, 0), (0, Ip - n_in))) if Ip != n_in else x
    h = jnp.tanh(jnp.dot(xp, w1p.astype(jnp.float32)) + b1p)
    h = jnp.tanh(jnp.dot(h, w2p.astype(jnp.float32)) + b2p)
    return jnp.dot(h, w3p.astype(jnp.float32)) + b3p


def policy_forward(x, padded_params, std, *, min_pallas_batch=_MIN_PALLAS_BATCH):
    """Returns (mean, std) -- the sufficient statistics of Normal(mean, std)."""
    args = (padded_params["w1"], padded_params["b1"],
            padded_params["w2"], padded_params["b2"],
            padded_params["w3"], padded_params["b3"])
    if x.shape[0] < min_pallas_batch:
        mean = _policy_forward_xla(x, *args)
    else:
        mean = _policy_forward_pallas(x, *args)
    return mean, std


# --------------------------- parameter init -------------------------------- #
def _orthogonal(key, rows, cols, gain):
    """Deterministic orthogonal init, analogous to torch.nn.init.orthogonal_."""
    a = jax.random.normal(key, (rows, cols), dtype=jnp.float32)
    if rows < cols:
        a = a.T
    q, r = jnp.linalg.qr(a)
    q = q * jnp.sign(jnp.diagonal(r))[None, :]
    if rows < cols:
        q = q.T
    return (gain * q[:rows, :cols]).astype(jnp.float32)


def init_policy_params(key, num_input, num_output, num_hidden):
    k1, k2, k3 = jax.random.split(key, 3)
    sqrt2 = jnp.sqrt(2.0)
    # torch Linear weight is (out, in); store transposed (in, out) for the kernel.
    w1 = _orthogonal(k1, num_hidden, num_input, sqrt2).T
    b1 = jnp.zeros((num_hidden,), jnp.float32)
    w2 = _orthogonal(k2, num_hidden, num_hidden, sqrt2).T
    b2 = jnp.zeros((num_hidden,), jnp.float32)
    w3 = _orthogonal(k3, num_output, num_hidden, 0.01).T
    b3 = jnp.zeros((num_output,), jnp.float32)
    log_std = jnp.full((1, num_output), -0.5, jnp.float32)
    return w1, b1, w2, b2, w3, b3, log_std


# ------------------------------ reference ---------------------------------- #
def policy_forward_ref(x, w1, b1, w2, b2, w3, b3, log_std):
    h = jnp.tanh(x @ w1 + b1)
    h = jnp.tanh(h @ w2 + b2)
    mean = h @ w3 + b3
    std = jnp.exp(jnp.clip(log_std, LOG_STD_MIN, LOG_STD_MAX))
    return mean, std


if __name__ == "__main__":
    num_input, num_output, num_hidden = 8, 4, 32

    key = jax.random.PRNGKey(0)
    kx1, kx2, kp = jax.random.split(key, 3)
    raw_params = init_policy_params(kp, num_input, num_output, num_hidden)

    # Pad weights / precompute std ONCE.
    params_bf16, std = prepare_params(*raw_params)                         # bf16 (default)
    params_f32, _ = prepare_params(*raw_params, matmul_dtype=jnp.float32)  # exact path

    # --- small batch (B=2): force the Pallas path so the kernel is exercised;
    #     real RL callers should batch many env steps or hit the XLA bypass. ---
    x_small = jax.random.normal(kx1, (2, num_input), dtype=jnp.float32)
    mean_s, std_s = policy_forward(x_small, params_bf16, std, min_pallas_batch=0)
    jax.block_until_ready((mean_s, std_s))
    mref_s, sref_s = policy_forward_ref(x_small, *raw_params)
    assert mean_s.shape == (2, num_output)
    assert std_s.shape == (1, num_output)
    assert jnp.allclose(mean_s, mref_s, atol=2e-2, rtol=2e-2)   # bf16 operands
    assert jnp.allclose(std_s, sref_s, atol=1e-6, rtol=1e-6)

    # --- larger ragged batch (B=300): multi-step grid + minimal tail padding. ---
    x_big = jax.random.normal(kx2, (300, num_input), dtype=jnp.float32)
    mref_b, _ = policy_forward_ref(x_big, *raw_params)

    mean_b, _ = policy_forward(x_big, params_bf16, std)          # bf16 path
    jax.block_until_ready(mean_b)
    assert mean_b.shape == (300, num_output)
    assert jnp.allclose(mean_b, mref_b, atol=2e-2, rtol=2e-2)

    mean_f, _ = policy_forward(x_big, params_f32, std)           # f32 path: tight check
    jax.block_until_ready(mean_f)
    assert jnp.allclose(mean_f, mref_b, atol=1e-5, rtol=1e-5)

    # TODO(synk): Normal(mean, std) sampling / log_prob is reconstructed from
    # (mean, std) outside the kernel; a distribution object has no array form.
    print("KERNEL_OK")
</pallas_src>

<mosaic_0001>
module attributes {stable_mosaic.version = 11 : i64} {
  func.func @_policy_kernel(%arg0: i32, %arg1: memref<16x16xbf16, #tpu.memory_space<vmem>>, %arg2: memref<16x128xbf16, #tpu.memory_space<vmem>>, %arg3: memref<1x128xf32, #tpu.memory_space<vmem>>, %arg4: memref<128x128xbf16, #tpu.memory_space<vmem>>, %arg5: memref<1x128xf32, #tpu.memory_space<vmem>>, %arg6: memref<128x4xbf16, #tpu.memory_space<vmem>>, %arg7: memref<1x4xf32, #tpu.memory_space<vmem>>, %arg8: memref<16x4xf32, #tpu.memory_space<vmem>>) attributes {dimension_semantics = [#tpu.dimension_semantics<parallel>], iteration_bounds = array<i64: 1>, scalar_prefetch = 0 : i64, scratch_operands = 0 : i64, tpu.core_type = #tpu.core_type<tc>, window_params = [{transform_indices = @transform_0, window_bounds = array<i64: 16, 16>}, {pipeline_mode = #tpu.pipeline_mode<synchronous>, transform_indices = @transform_1, window_bounds = array<i64: 16, 128>}, {pipeline_mode = #tpu.pipeline_mode<synchronous>, transform_indices = @transform_2, window_bounds = array<i64: 1, 128>}, {pipeline_mode = #tpu.pipeline_mode<synchronous>, transform_indices = @transform_3, window_bounds = array<i64: 128, 128>}, {pipeline_mode = #tpu.pipeline_mode<synchronous>, transform_indices = @transform_4, window_bounds = array<i64: 1, 128>}, {pipeline_mode = #tpu.pipeline_mode<synchronous>, transform_indices = @transform_5, window_bounds = array<i64: 128, 4>}, {pipeline_mode = #tpu.pipeline_mode<synchronous>, transform_indices = @transform_6, window_bounds = array<i64: 1, 4>}, {transform_indices = @transform_7, window_bounds = array<i64: 16, 4>}]} {
    %c0 = arith.constant 0 : index
    %c0_0 = arith.constant 0 : index
    %0 = vector.load %arg1[%c0, %c0_0] : memref<16x16xbf16, #tpu.memory_space<vmem>>, vector<16x16xbf16>
    %c0_1 = arith.constant 0 : index
    %c0_2 = arith.constant 0 : index
    %1 = vector.load %arg2[%c0_1, %c0_2] : memref<16x128xbf16, #tpu.memory_space<vmem>>, vector<16x128xbf16>
    %cst = arith.constant dense<0.000000e+00> : vector<16x128xf32>
    %2 = tpu.matmul %0, %1, %cst {dimension_numbers = #tpu.dot_dimension_numbers<[1], [0], [0], [1], [0, 0, 1, 1], [], []>} : vector<16x16xbf16>, vector<16x128xbf16>, vector<16x128xf32> -> vector<16x128xf32>
    %c0_3 = arith.constant 0 : index
    %c0_4 = arith.constant 0 : index
    %3 = vector.load %arg3[%c0_3, %c0_4] : memref<1x128xf32, #tpu.memory_space<vmem>>, vector<1x128xf32>
    %4 = vector.broadcast %3 : vector<1x128xf32> to vector<16x128xf32>
    %5 = arith.addf %2, %4 : vector<16x128xf32>
    %6 = math.tanh %5 : vector<16x128xf32>
    %7 = arith.truncf %6 : vector<16x128xf32> to vector<16x128xbf16>
    %c0_5 = arith.constant 0 : index
    %c0_6 = arith.constant 0 : index
    %8 = vector.load %arg4[%c0_5, %c0_6] : memref<128x128xbf16, #tpu.memory_space<vmem>>, vector<128x128xbf16>
    %cst_7 = arith.constant dense<0.000000e+00> : vector<16x128xf32>
    %9 = tpu.matmul %7, %8, %cst_7 {dimension_numbers = #tpu.dot_dimension_numbers<[1], [0], [0], [1], [0, 0, 1, 1], [], []>} : vector<16x128xbf16>, vector<128x128xbf16>, vector<16x128xf32> -> vector<16x128xf32>
    %c0_8 = arith.constant 0 : index
    %c0_9 = arith.constant 0 : index
    %10 = vector.load %arg5[%c0_8, %c0_9] : memref<1x128xf32, #tpu.memory_space<vmem>>, vector<1x128xf32>
    %11 = vector.broadcast %10 : vector<1x128xf32> to vector<16x128xf32>
    %12 = arith.addf %9, %11 : vector<16x128xf32>
    %13 = math.tanh %12 : vector<16x128xf32>
    %14 = arith.truncf %13 : vector<16x128xf32> to vector<16x128xbf16>
    %c0_10 = arith.constant 0 : index
    %c0_11 = arith.constant 0 : index
    %15 = vector.load %arg6[%c0_10, %c0_11] : memref<128x4xbf16, #tpu.memory_space<vmem>>, vector<128x4xbf16>
    %cst_12 = arith.constant dense<0.000000e+00> : vector<16x4xf32>
    %16 = tpu.matmul %14, %15, %cst_12 {dimension_numbers = #tpu.dot_dimension_numbers<[1], [0], [0], [1], [0, 0, 1, 1], [], []>} : vector<16x128xbf16>, vector<128x4xbf16>, vector<16x4xf32> -> vector<16x4xf32>
    %c0_13 = arith.constant 0 : index
    %c0_14 = arith.constant 0 : index
    %17 = vector.load %arg7[%c0_13, %c0_14] : memref<1x4xf32, #tpu.memory_space<vmem>>, vector<1x4xf32>
    %18 = vector.broadcast %17 : vector<1x4xf32> to vector<16x4xf32>
    %19 = arith.addf %16, %18 : vector<16x4xf32>
    %c0_15 = arith.constant 0 : index
    %c0_16 = arith.constant 0 : index
    %20 = vector.load %arg8[%c0_15, %c0_16] : memref<16x4xf32, #tpu.memory_space<vmem>>, vector<16x4xf32>
    tpu.vector_store %arg8[%c0_15, %c0_16], %19 {strides = array<i32>} : memref<16x4xf32, #tpu.memory_space<vmem>>, vector<16x4xf32>,
    return
  }
  func.func @transform_0(%arg0: i32) -> (i32, i32) {
    %c0_i32 = arith.constant 0 : i32
    %c0_i32_0 = arith.constant 0 : i32
    return %arg0, %c0_i32 : i32, i32
  }
  func.func @transform_1(%arg0: i32) -> (i32, i32) {
    %c0_i32 = arith.constant 0 : i32
    %c0_i32_0 = arith.constant 0 : i32
    %c0_i32_1 = arith.constant 0 : i32
    return %c0_i32, %c0_i32_0 : i32, i32
  }
  func.func @transform_2(%arg0: i32) -> (i32, i32) {
    %c0_i32 = arith.constant 0 : i32
    %c0_i32_0 = arith.constant 0 : i32
    %c0_i32_1 = arith.constant 0 : i32
    return %c0_i32, %c0_i32_0 : i32, i32
  }
  func.func @transform_3(%arg0: i32) -> (i32, i32) {
    %c0_i32 = arith.constant 0 : i32
    %c0_i32_0 = arith.constant 0 : i32
    %c0_i32_1 = arith.constant 0 : i32
    return %c0_i32, %c0_i32_0 : i32, i32
  }
  func.func @transform_4(%arg0: i32) -> (i32, i32) {
    %c0_i32 = arith.constant 0 : i32
    %c0_i32_0 = arith.constant 0 : i32
    %c0_i32_1 = arith.constant 0 : i32
    return %c0_i32, %c0_i32_0 : i32, i32
  }
  func.func @transform_5(%arg0: i32) -> (i32, i32) {
    %c0_i32 = arith.constant 0 : i32
    %c0_i32_0 = arith.constant 0 : i32
    %c0_i32_1 = arith.constant 0 : i32
    return %c0_i32, %c0_i32_0 : i32, i32
  }
  func.func @transform_6(%arg0: i32) -> (i32, i32) {
    %c0_i32 = arith.constant 0 : i32
    %c0_i32_0 = arith.constant 0 : i32
    %c0_i32_1 = arith.constant 0 : i32
    return %c0_i32, %c0_i32_0 : i32, i32
  }
  func.func @transform_7(%arg0: i32) -> (i32, i32) {
    %c0_i32 = arith.constant 0 : i32
    %c0_i32_0 = arith.constant 0 : i32
    return %arg0, %c0_i32 : i32, i32
  }
}

</mosaic_0001>

<bundles_post_ra>
// kernel: _policy_forward_pallas.1
= control target key start
LH: loop header
LB: loop body
LE: loop exit
PB: predicated region body
PF: predicated region fallthrough
CT: control target
= control target key end

     0   :  { %v447_v0 = vmov 0.0   ;;  %vm448_vm0 = vmmov 0   ;;  %vm49_vm1 = vcmask 130048   ;;  %vm324_vm2 = vcmask 31744   ;;  %s578_s1 = inlined_call_operand.vmem [shape: bf16[16,128], index: 1, kind: input, shape index: {}]   ;;  %s579_s0 = inlined_call_operand.vmem [shape: bf16[16,16], index: 0, kind: input, shape index: {}]   ;;  %s580_s3 = inlined_call_operand.vmem [shape: bf16[128,128], index: 3, kind: input, shape index: {}]   ;;  %s581_s5 = inlined_call_operand.vmem [shape: bf16[128,4], index: 5, kind: input, shape index: {}]   ;;  %s582_s2 = inlined_call_operand.vmem [shape: f32[1,128], index: 2, kind: input, shape index: {}]   ;;  %s583_s4 = inlined_call_operand.vmem [shape: f32[1,128], index: 4, kind: input, shape index: {}]   ;;  %s584_s6 = inlined_call_operand.vmem [shape: f32[1,4], index: 6, kind: input, shape index: {}]   ;;  %s585_s7 = inlined_call_operand.vmem [shape: f32[16,4], index: 7, kind: output, shape index: {}]  }
   0x1   :  { %373 = vmatprep.subr.bf16.mxu0 %v447_v0  ;;  %v421_v1 = vld [vmem:[%s578_s1] sm:$0xff]   ;;  %375 = vmatprep.mubr.msk.bf16.mxu0 %vm448_vm0, %v447_v0  ;;  %v424_v4 = vld [vmem:[%s580_s3 + $0x8] sm:$0xff]   ;;  %v425_v5 = vld [vmem:[%s580_s3 + $0x10] sm:$0xff]  }
   0x2   :  { %v422_v2 = vld [vmem:[%s579_s0] sm:$0xff]   ;;  %379 = vmatprep.subr.bf16.mxu1 %v447_v0  ;;  %395 = vmatprep.mubr.msk.bf16.mxu1 %vm448_vm0, %v447_v0  ;;  %v426_v6 = vld [vmem:[%s580_s3 + $0x18] sm:$0xff]   ;;  %v428_v8 = vld [vmem:[%s580_s3 + $0x28] sm:$0xff]  }
   0x3   :  { %374 = vmatpush3.bf16.msra.mxu0 %v421_v1  ;;  %v423_v3 = vld [vmem:[%s580_s3] sm:$0xff]   ;;  %v429_v9 = vld [vmem:[%s580_s3 + $0x30] sm:$0xff]   ;;  %v430_v10 = vld [vmem:[%s580_s3 + $0x38] sm:$0xff]  }
   0x4   :  { %399 = vmatprep.subr.bf16.mxu0 %v447_v0  ;;  %380 = vmatpush3.bf16.msra.mxu1 %v423_v3  ;;  %v427_v7 = vld [vmem:[%s580_s3 + $0x20] sm:$0xff]   ;;  %v432_v12 = vld [vmem:[%s581_s5 + $0x8] sm:$0xff]   ;;  %v433_v13 = vld [vmem:[%s581_s5 + $0x10] sm:$0xff]  }
   0x5   :  { %381 = vmatprep.subr.bf16.mxu1 %v447_v0  ;;  %v431_v11 = vld [vmem:[%s581_s5] sm:$0xff]   ;;  %v434_v14 = vld [vmem:[%s581_s5 + $0x18] sm:$0xff]   ;;  %v436_v26 = vld [vmem:[%s581_s5 + $0x28] sm:$0xff]  }
   0x6   :  { %376 = vmatmul.mubr.msk.bf16.vlgmr.msra.gmra.mrb[0].mxu0 %vm49_vm1, %v422_v2  ;;  %v331_v15 = vld [vmem:[%s582_s2] ss:$0 sm:$0xff]  ;;  %v437_v27 = vld [vmem:[%s581_s5 + $0x30] sm:$0xff]   ;;  %v438_v28 = vld [vmem:[%s581_s5 + $0x38] sm:$0xff]  }
   0x7   :  { %415 = vmatprep.mubr.msk.bf16.mxu0 %vm448_vm0, %v447_v0  ;;  %400 = vmatpush3.bf16.msra.mxu0 %v431_v11  ;;  %v435_v25 = vld [vmem:[%s581_s5 + $0x20] sm:$0xff]  }
   0x8   :  { %382 = vmatpush3.bf16.msra.mxu1 %v424_v4  ;;  %401 = vmatprep.subr.bf16.mxu0 %v447_v0  ;;  %v335_v29 = vld [vmem:[%s583_s4] ss:$0 sm:$0xff] }
   0x9   :  { %383 = vmatprep.subr.bf16.mxu1 %v447_v0  ;;  %v344_v39 = vld [vmem:[%s584_s6] ss:$0 sm:$0xff] }
   0xb   :  { %402 = vmatpush3.bf16.msra.mxu0 %v432_v12 }
   0xc   :  { %384 = vmatpush3.bf16.msra.mxu1 %v425_v5  ;;  %403 = vmatprep.subr.bf16.mxu0 %v447_v0 }
   0xd   :  { %385 = vmatprep.subr.bf16.mxu1 %v447_v0 }
   0xf   :  { %404 = vmatpush3.bf16.msra.mxu0 %v433_v13 }
  0x10   :  { %386 = vmatpush3.bf16.msra.mxu1 %v426_v6  ;;  %405 = vmatprep.subr.bf16.mxu0 %v447_v0 }
  0x11   :  { %387 = vmatprep.subr.bf16.mxu1 %v447_v0 }
  0x13   :  { %406 = vmatpush3.bf16.msra.mxu0 %v434_v14 }
  0x14   :  { %388 = vmatpush3.bf16.msra.mxu1 %v427_v7  ;;  %407 = vmatprep.subr.bf16.mxu0 %v447_v0 }
  0x15   :  { %389 = vmatprep.subr.bf16.mxu1 %v447_v0 }
  0x17   :  { %408 = vmatpush3.bf16.msra.mxu0 %v435_v25 }
  0x18   :  { %390 = vmatpush3.bf16.msra.mxu1 %v428_v8  ;;  %409 = vmatprep.subr.bf16.mxu0 %v447_v0 }
  0x19   :  { %391 = vmatprep.subr.bf16.mxu1 %v447_v0 }
  0x1b   :  { %410 = vmatpush3.bf16.msra.mxu0 %v436_v26 }
  0x1c   :  { %392 = vmatpush3.bf16.msra.mxu1 %v429_v9  ;;  %411 = vmatprep.subr.bf16.mxu0 %v447_v0 }
  0x1d   :  { %393 = vmatprep.subr.bf16.mxu1 %v447_v0 }
  0x1f   :  { %412 = vmatpush3.bf16.msra.mxu0 %v437_v27 }
  0x20   :  { %394 = vmatpush3.bf16.msra.mxu1 %v430_v10  ;;  %413 = vmatprep.subr.bf16.mxu0 %v447_v0 }
  0x23   :  { %414 = vmatpush3.bf16.msra.mxu0 %v438_v28 }
  0xd9   :  { %v87_v16 = vpop.f32.mrb[0].mxu0 }
  0xda   :  { %v88_v17 = vadd.f32 %v331_v15, %v87_v16  ;;  %v377_v18 = vpop.f32.mrb[1].mxu0 }
  0xdb   :  { %v90_v19 = vpop.f32.mrb[2].mxu0 }
  0xdc   :  { %v91_v20 = vadd.f32 %v331_v15, %v90_v19  ;;  %v378_v21 = vpop.f32.mrb[3].mxu0  ;;  %439 = vtanh.f32 %v88_v17 }
  0xde   :  { %441 = vtanh.f32 %v91_v20 }
  0xe6   :  { %v440_v22 = vpop.eup %439 }
  0xe8   :  { %v442_v23 = vpop.eup %441 }
  0xe9   :  { %v96_v24 = vpack.c.bf16 %v442_v23, %v440_v22 }
  0xeb   :  { %396 = vmatmul.mubr.bf16.vlgmr.msra.gmra.mrb[0].mxu1 %v96_v24 }
 0x1be   :  { %v202_v30 = vpop.f32.mrb[0].mxu1 }
 0x1bf   :  { %v203_v31 = vadd.f32 %v335_v29, %v202_v30  ;;  %v397_v32 = vpop.f32.mrb[1].mxu1 }
 0x1c0   :  { %v205_v33 = vpop.f32.mrb[2].mxu1 }
 0x1c1   :  { %v206_v34 = vadd.f32 %v335_v29, %v205_v33  ;;  %v398_v35 = vpop.f32.mrb[3].mxu1  ;;  %443 = vtanh.f32 %v203_v31 }
 0x1c3   :  { %445 = vtanh.f32 %v206_v34 }
 0x1cb   :  { %v444_v36 = vpop.eup %443 }
 0x1cd   :  { %v446_v37 = vpop.eup %445 }
 0x1ce   :  { %v211_v38 = vpack.c.bf16 %v446_v37, %v444_v36 }
 0x1d0   :  { %416 = vmatmul.mubr.bf16.vlgmr.msra.gmra.mrb[4].mxu0 %v211_v38 }
 0x2a3   :  { %v317_v40 = vpop.f32.mrb[4].mxu0 }
 0x2a4   :  { %v318_v41 = vadd.f32 %v344_v39, %v317_v40  ;;  %v417_v42 = vpop.f32.mrb[5].mxu0 }
 0x2a5   :  { %v320_v43 = vpop.f32.mrb[6].mxu0 }
 0x2a6   :  { %325 = vst.msk [vmem:[%s585_s7] sm:$0xff] %vm324_vm2, %v318_v41  ;;  %v321_v44 = vadd.f32 %v344_v39, %v320_v43  ;;  %v418_v45 = vpop.f32.mrb[7].mxu0 }
 0x2a8   :  { %326 = vst.msk [vmem:[%s585_s7 + $0x8] sm:$0xff] %vm324_vm2, %v321_v44 }

</bundles_post_ra>
